<compile_context>
chip_gen: v6e
topology: v6e:2x2x1
jax: 0.10.0
libtpu: 0.0.40
codegen_flags: <defaults>
</compile_context>

<pallas_src>
import jax
import jax.numpy as jnp
from jax.experimental import pallas as pl
from jax.experimental.pallas import tpu as pltpu


def st_gcn_kernel(x_ref, w_ref, b_ref, o_ref):
    # x_ref: (t_tile, Dp)       im2col'd input rows for one (sample, T-tile)
    # w_ref: (Dp, C_out*W)      A-folded effective conv weight (grid-invariant)
    # b_ref: (1, C_out*W)       A-folded conv bias, f32 (grid-invariant)
    # o_ref: (t_tile, C_out*W)  output rows, lane-dense last dim
    acc = jnp.dot(x_ref[...], w_ref[...],
                  preferred_element_type=jnp.float32)   # single deep MXU matmul
    o_ref[...] = (acc + b_ref[...]).astype(o_ref.dtype)


def st_gcn_forward(x, A, weight, bias, *, kernel_size,
                   compute_dtype=jnp.bfloat16, t_tile=None, depth_align=128):
    """x: (N, C_in, T, V); A: (K, V, W); weight: (K*C_out, C_in, 5, 1); bias: (K*C_out,)."""
    N, C_in, T, V = x.shape
    K, V2, W = A.shape
    assert K == kernel_size and V2 == V
    KC, C_in2, KT, KW1 = weight.shape
    assert C_in2 == C_in and KW1 == 1
    # The module hard-codes t_kernel_size=5 / t_padding=2; assert rather than
    # silently changing semantics for other KT.
    assert KT == 5, "ST_GCN uses a fixed temporal kernel of 5 with padding 2"
    t_pad = 2
    C_out = KC // K
    CW = C_out * W
    D = C_in * KT * V
    Dp = ((D + depth_align - 1) // depth_align) * depth_align   # lane-aligned depth

    if t_tile is None:
        t_tile = T                       # toy shapes: one T tile per sample
    assert T % t_tile == 0

    # ---- one-time wrapper-side layout prep (tiny XLA ops) -------------------
    # Fold A into the conv weight (k and v disappear from the kernel entirely).
    w4 = weight[:, :, :, 0].reshape(K, C_out, C_in, KT).astype(jnp.float32)
    w_eff = jnp.einsum('kcid,kvw->idvcw', w4, A.astype(jnp.float32))
    w_eff = w_eff.reshape(D, CW)
    w_eff = jnp.pad(w_eff, ((0, Dp - D), (0, 0))).astype(compute_dtype)

    # Fold the conv bias through A: bias_cw[c,w] = sum_k b[k,c] * sum_v A[k,v,w].
    bias_cw = jnp.einsum('kc,kw->cw',
                         bias.reshape(K, C_out).astype(jnp.float32),
                         A.astype(jnp.float32).sum(axis=1)).reshape(1, CW)

    # im2col over the 5 temporal taps, hoisted out of the kernel.
    x_pad = jnp.pad(x, ((0, 0), (0, 0), (t_pad, t_pad), (0, 0)))
    taps = jnp.stack([x_pad[:, :, dt:dt + T, :] for dt in range(KT)], axis=2)
    # (N, C_in, KT, T, V) -> (N, T, C_in*KT*V): rows are (sample, time), depth
    # order (ci, dt, v) matches w_eff's contraction order.
    x_cols = taps.transpose(0, 3, 1, 2, 4).reshape(N, T, D)
    x_cols = jnp.pad(x_cols, ((0, 0), (0, 0), (0, Dp - D))).astype(compute_dtype)

    out = pl.pallas_call(
        st_gcn_kernel,
        out_shape=jax.ShapeDtypeStruct((N, T, CW), x.dtype),
        grid_spec=pltpu.PrefetchScalarGridSpec(
            num_scalar_prefetch=0,
            grid=(N, T // t_tile),
            in_specs=[
                pl.BlockSpec((pl.Squeezed(), t_tile, Dp),
                             lambda n, ti: (n, ti, 0)),
                # Grid-invariant operands (now only ~Dp*CW*2 B, i.e. tiny).
                pl.BlockSpec((Dp, CW), lambda n, ti: (0, 0)),
                pl.BlockSpec((1, CW), lambda n, ti: (0, 0)),
            ],
            out_specs=pl.BlockSpec((pl.Squeezed(), t_tile, CW),
                                   lambda n, ti: (n, ti, 0)),
        ),
        compiler_params=pltpu.CompilerParams(
            dimension_semantics=("parallel", "parallel"),
            vmem_limit_bytes=32 * 1024 * 1024),
    )(x_cols, w_eff, bias_cw)

    # (N, T, C_out*W) -> (N, C_out, T, W)
    out = out.reshape(N, T, C_out, W).transpose(0, 2, 1, 3)
    return out, A


def st_gcn_reference(x, A, weight, bias, *, kernel_size):
    """Plain-JAX reference replicating the PyTorch module."""
    y = jax.lax.conv_general_dilated(
        x, weight,
        window_strides=(1, 1),
        padding=((2, 2), (0, 0)),
        dimension_numbers=("NCHW", "OIHW", "NCHW"),
    ) + bias[None, :, None, None]
    n, kc, t, v = y.shape
    y = y.reshape(n, kernel_size, kc // kernel_size, t, v)
    return jnp.einsum('nkctv,kvw->nctw', y, A)


if __name__ == "__main__":
    # Small shapes consistent with the module.
    N, C_in, C_out, K, T, V = 2, 4, 8, 3, 8, 16
    key = jax.random.PRNGKey(0)
    kx, ka, kw, kb = jax.random.split(key, 4)

    x = jax.random.normal(kx, (N, C_in, T, V), dtype=jnp.float32)
    A = jax.random.normal(ka, (K, V, V), dtype=jnp.float32)
    weight = jax.random.normal(kw, (C_out * K, C_in, 5, 1), dtype=jnp.float32) * 0.1
    bias = jax.random.normal(kb, (C_out * K,), dtype=jnp.float32) * 0.1

    ref = st_gcn_reference(x, A, weight, bias, kernel_size=K)

    # 1) Exact-semantics check: all-f32 operands.
    out_f32, A_out = st_gcn_forward(x, A, weight, bias, kernel_size=K,
                                    compute_dtype=jnp.float32)
    out_f32 = jax.block_until_ready(out_f32)
    assert out_f32.shape == (N, C_out, T, V)
    assert jnp.allclose(out_f32, ref, atol=2e-3, rtol=2e-3), "f32 kernel mismatch"
    assert jnp.array_equal(A_out, A)

    # 2) Fast path: bf16 MXU operands, f32 accumulation (v6e/v7x fast path).
    out_bf16, _ = st_gcn_forward(x, A, weight, bias, kernel_size=K,
                                 compute_dtype=jnp.bfloat16)
    out_bf16 = jax.block_until_ready(out_bf16)
    err = float(jnp.max(jnp.abs(out_bf16 - ref)))
    scale = float(jnp.max(jnp.abs(ref)))
    assert err <= 0.02 * scale, f"bf16 kernel error too large: {err} (scale {scale})"

    print("KERNEL_OK")
</pallas_src>

<mosaic_0001>
module attributes {stable_mosaic.version = 11 : i64} {
  func.func @st_gcn_kernel(%arg0: i32, %arg1: i32, %arg2: memref<1x8x384xf32, #tpu.memory_space<vmem>>, %arg3: memref<384x128xf32, #tpu.memory_space<vmem>>, %arg4: memref<1x128xf32, #tpu.memory_space<vmem>>, %arg5: memref<1x8x128xf32, #tpu.memory_space<vmem>>) attributes {dimension_semantics = [#tpu.dimension_semantics<parallel>, #tpu.dimension_semantics<parallel>], iteration_bounds = array<i64: 2, 1>, scalar_prefetch = 0 : i64, scratch_operands = 0 : i64, tpu.core_type = #tpu.core_type<tc>, window_params = [{transform_indices = @transform_0, window_bounds = array<i64: 1, 8, 384>}, {pipeline_mode = #tpu.pipeline_mode<synchronous>, transform_indices = @transform_1, window_bounds = array<i64: 384, 128>}, {pipeline_mode = #tpu.pipeline_mode<synchronous>, transform_indices = @transform_2, window_bounds = array<i64: 1, 128>}, {transform_indices = @transform_3, window_bounds = array<i64: 1, 8, 128>}]} {
    %c0 = arith.constant 0 : index
    %c0_0 = arith.constant 0 : index
    %c0_1 = arith.constant 0 : index
    %0 = vector.load %arg2[%c0, %c0_0, %c0_1] : memref<1x8x384xf32, #tpu.memory_space<vmem>>, vector<1x8x384xf32>
    %1 = vector.shape_cast %0 : vector<1x8x384xf32> to vector<8x384xf32>
    %c0_2 = arith.constant 0 : index
    %c0_3 = arith.constant 0 : index
    %2 = vector.load %arg3[%c0_2, %c0_3] : memref<384x128xf32, #tpu.memory_space<vmem>>, vector<384x128xf32>
    %cst = arith.constant dense<0.000000e+00> : vector<8x128xf32>
    %3 = tpu.matmul %1, %2, %cst {dimension_numbers = #tpu.dot_dimension_numbers<[1], [0], [0], [1], [0, 0, 1, 1], [], []>} : vector<8x384xf32>, vector<384x128xf32>, vector<8x128xf32> -> vector<8x128xf32>
    %c0_4 = arith.constant 0 : index
    %c0_5 = arith.constant 0 : index
    %4 = vector.load %arg4[%c0_4, %c0_5] : memref<1x128xf32, #tpu.memory_space<vmem>>, vector<1x128xf32>
    %5 = vector.broadcast %4 : vector<1x128xf32> to vector<8x128xf32>
    %6 = arith.addf %3, %5 : vector<8x128xf32>
    %c0_6 = arith.constant 0 : index
    %c0_7 = arith.constant 0 : index
    %c0_8 = arith.constant 0 : index
    %7 = vector.load %arg5[%c0_6, %c0_7, %c0_8] : memref<1x8x128xf32, #tpu.memory_space<vmem>>, vector<1x8x128xf32>
    %8 = vector.shape_cast %7 : vector<1x8x128xf32> to vector<8x128xf32>
    %9 = vector.shape_cast %6 : vector<8x128xf32> to vector<1x8x128xf32>
    tpu.vector_store %arg5[%c0_6, %c0_7, %c0_8], %9 {strides = array<i32>} : memref<1x8x128xf32, #tpu.memory_space<vmem>>, vector<1x8x128xf32>,
    return
  }
  func.func @transform_0(%arg0: i32, %arg1: i32) -> (i32, i32, i32) {
    %c0_i32 = arith.constant 0 : i32
    %c0_i32_0 = arith.constant 0 : i32
    return %arg0, %arg1, %c0_i32 : i32, i32, i32
  }
  func.func @transform_1(%arg0: i32, %arg1: i32) -> (i32, i32) {
    %c0_i32 = arith.constant 0 : i32
    %c0_i32_0 = arith.constant 0 : i32
    %c0_i32_1 = arith.constant 0 : i32
    return %c0_i32, %c0_i32_0 : i32, i32
  }
  func.func @transform_2(%arg0: i32, %arg1: i32) -> (i32, i32) {
    %c0_i32 = arith.constant 0 : i32
    %c0_i32_0 = arith.constant 0 : i32
    %c0_i32_1 = arith.constant 0 : i32
    return %c0_i32, %c0_i32_0 : i32, i32
  }
  func.func @transform_3(%arg0: i32, %arg1: i32) -> (i32, i32, i32) {
    %c0_i32 = arith.constant 0 : i32
    %c0_i32_0 = arith.constant 0 : i32
    return %arg0, %arg1, %c0_i32 : i32, i32, i32
  }
}

</mosaic_0001>

<bundles_post_ra>
// kernel: tpu_custom_call.1
= control target key start
LH: loop header
LB: loop body
LE: loop exit
PB: predicated region body
PF: predicated region fallthrough
CT: control target
= control target key end

     0   :  { %8 = vsyncpa [#allocation3], 0  ;;  %s1061_s0 = inlined_call_operand.hbm [shape: f32[2,8,384], index: 0, kind: input, shape index: {}]   ;;  %s1062_s1 = inlined_call_operand.hbm [shape: f32[384,128], index: 1, kind: input, shape index: {}]   ;;  %s1063_s2 = inlined_call_operand.vmem [shape: f32[1,128], index: 2, kind: input, shape index: {}]   ;;  %s1064_s3 = inlined_call_operand.hbm [shape: f32[2,8,128], index: 3, kind: output, shape index: {}]  }
   0x1   :  { %10 = vsyncpa [#allocation3 + $0x1], 0 }
   0x2   :  { %11 = vsyncpa [#allocation6], 0 }
   0x3   :  { %12 = vsyncpa [#allocation4], 0 }
   0x4   :  { %14 = vsyncpa [#allocation4 + $0x1], 0  ;;  %s874_s12 = smov 0   ;;  %s876_s13 = smov 0  }
   0x5   :  { %s878_s14 = smov 0   ;;  %s880_s15 = smov 0  }
   0x6   :  { %s882_s16 = smov 0   ;;  %s884_s17 = smov 0  }
   0x7 LB: > { %s526_s18 = sadd.s32 4294967295, %s845_s17   ;;  %s527_s19 = sadd.s32 4294967294, %s845_s17   ;;  %s845_s17 = sphi %s884_s17, %s20_s17   ;;  %s841_s16 = sphi %s882_s16, %s1080_s16   ;;  %s837_s15 = sphi %s880_s15, %s1079_s15   ;;  %s833_s14 = sphi %s878_s14, %s1078_s14   ;;  %s829_s13 = sphi %s876_s13, %s1077_s13   ;;  %s825_s12 = sphi %s874_s12, %s1076_s12  }
   0x8   : > { %p54_p0 = scmp.ne.s32.totalorder %s829_s13, %s825_s12  ;;  %p908_p1 = scmp.eq.s32.totalorder %s526_s18, 0 }
   0x9   : > { %p912_p2 = scmp.eq.s32.totalorder %s526_s18, 1  ;;  %p128_p3 = scmp.eq.s32.totalorder %s527_s19, 1 }
   0xa   : > { %p918_p4 = por %p908_p1, %p54_p0  ;;  %p528_p5 = scmp.ge.s32.totalorder %s845_s17, 1 }
   0xb   : > { %p923_p6 = por %p128_p3, %p54_p0  ;;  %p135_p7 = scmp.lt.s32.totalorder %s845_s17, 3 }
   0xc   : > { %s1068_s22 = scalar_select %p918_p4, 1, 0 }
   0xd   : > { %s1069_s23 = scalar_select %p923_p6, 1, 0 }
   0xe   : > { %p928_p8 = pnand %p528_p5, %p135_p7  ;;  %s847_s25 = smov [#allocation5]  }
   0xf   : > { %s147_s26 = sshll.u32 %s847_s25, 4  ;;  %p530_p10 = scmp.ge.s32.totalorder %s845_s17, 2  ;;  %s148_s26 = int_to_ptr.vmem [resolvable:$true] %s147_s26 }
  0x10   : > { %p638_p9 = pneg %p928_p8  ;;  %s32_s28 = sadd.s32 1, %s841_s16 }
  0x11   : > { %s718_s29 = scalar_lea.vmem %s148_s26, 6144  ;;  %p726_p5 = scmp.lt.s32.totalorder %s148_s26, %s148_s26 }
  0x12   : > { %p937_p11 = pnand %p638_p9, %p908_p1  ;;  %p719_p13 = scmp.ne.s32.totalorder %s148_s26, %s718_s29 }
  0x13   : > { %p727_p7 = scmp.lt.s32.totalorder %s718_s29, %s718_s29 }
  0x14   : > { %p709_p12 = pneg %p937_p11 }
  0x15   : > { %p728_p6 = por %p727_p7, %p726_p5 }
  0x16   : > { %p721_p0 = pnand %p719_p13, %p709_p12 }
  0x18   : > { %p722_p3 = pneg %p721_p0 }
  0x1a   : > { %p729_p4 = pnand %p728_p6, %p722_p3 }
  0x1c   : > { %732 = shalt.err (!%p729_p4)
}
  0x1d   : > { %s848_s30 = smov 128   ;;  %s849_s4 = smov 8  }
  0x1e   : > { %641 = dma.hbm_to_vmem [thread:$0]  (!%p937_p11), %s1062_s1, 6144, %s148_s26, [#allocation6], %s848_s30, %s848_s30, %s849_s4  }
  0x1f   : > { %p34_p6 = scmp.ge.s32.totalorder %s32_s28, 2  ;;  %s41_s7 = sadd.s32 1, %s833_s14 }
  0x20   : > { %p48_p4 = scmp.ne.s32.totalorder %s833_s14, %s829_s13  ;;  %p49_p9 = scmp.eq.s32.totalorder %s845_s17, 0 }
  0x21   : > { %s1082_s28 = smov (%p34_p6, %s32_s28), 0  ;;  %p651_p0 = scmp.lt.s32.totalorder %s845_s17, 2 }
  0x22   : > { %p50_p12 = por %p49_p9, %p48_p4  ;;  %p957_p13 = por %p912_p2, %p48_p4 }
  0x23   : > { %s36_s9 = ssub.s32 %s841_s16, %s1082_s28  ;;  %s164_s10 = sand.u32 1, %s833_s14  }
  0x24   : > { %p39_p3 = scmp.eq.s32.totalorder %s36_s9, 0  ;;  %s627_s11 = smul.u32 24, %s164_s10 }
  0x25   : > { %s628_s19 = smul.u32 384, %s841_s16  ;;  %p969_p11 = pnand %p651_p0, %p50_p12 }
  0x26   : > { %s966_s18 = scalar_select %p39_p3, %s833_s14, %s41_s7  }
  0x27   : > { %s168_s25 = scalar_lea.vmem [#allocation2], %s627_s11  ;;  %s176_s30 = scalar_lea.hbm %s1061_s0, %s628_s19 }
  0x28   : > { %s178_s26 = sshll.u32 %s168_s25, 4  ;;  %s165_s4 = scalar_lea.sflag [#allocation3], %s164_s10  ;;  %s179_s26 = int_to_ptr.vmem [resolvable:$true] %s178_s26 }
  0x29   : > { %p735_p2 = pneg %p969_p11  ;;  %s746_s5 = scalar_lea.vmem %s179_s26, 384 }
  0x2a   : > { %p747_p5 = scmp.ne.s32.totalorder %s179_s26, %s746_s5  ;;  %s850_s6 = smov [#allocation2]  }
  0x2b   : > { %s751_s7 = sshll.u32 %s850_s6, 4  ;;  %s752_s7 = int_to_ptr.vmem [resolvable:$false] %s751_s7 }
  0x2c   : > { %p749_p7 = pnand %p747_p5, %p735_p2  ;;  %s753_s9 = scalar_lea.vmem %s752_s7, 768 }
  0x2d   : > { %p754_p4 = scmp.lt.s32.totalorder %s179_s26, %s752_s7  ;;  %p755_p9 = scmp.lt.s32.totalorder %s753_s9, %s746_s5 }
  0x2e   : > { %p750_p6 = pneg %p749_p7 }
  0x2f   : > { %p756_p12 = por %p755_p9, %p754_p4 }
  0x31   : > { %p757_p0 = pnand %p756_p12, %p750_p6 }
  0x33   : > { %760 = shalt.err (!%p757_p0)
}
  0x34   : > { %645 = dma.hbm_to_vmem [thread:$0]  (!%p969_p11), %s176_s30, 384, %s179_s26, %s165_s4  }
  0x35   : > { %187 = sbr.rel (%p928_p8) target bundleno = 309 (0x135), region = 32  ;;  %s983_s10 = sand.u32 (!%p928_p8), 1, %s829_s13  }
  0x36   : > { %s629_s11 = smul.u32 (!%p928_p8), 24, %s983_s10  ;;  %s190_s19 = scalar_lea.sflag (!%p928_p8), [#allocation3], %s983_s10 }
  0x37   : > { %p1074_p3 = scmp.ne.s32.totalorder (!%p928_p8), %s1068_s22, 0 }
  0x38   : > { %s987_s25 = scalar_lea.vmem (!%p928_p8), [#allocation2], %s629_s11 }
  0x3a   : > { %812 = dma.done.wait (%p1074_p3), %s190_s19, 384  }
  0x3b   : > { %814 = vsyncadd (%p1074_p3), %s190_s19, 4294966912 }
  0x3c   : > { %816 = dma.done.wait (%p908_p1), [#allocation6], 6144  }
  0x3d   : > { %818 = vsyncadd (%p908_p1), [#allocation6], 4294961152  ;;  %v851_v0 = vmov 0.0   ;;  %vm852_vm0 = vmmov 0   ;;  %v254_v1 = vld [vmem:[#allocation5 + $0xf8] sm:$0xff]  ;;  %v253_v3 = vld [vmem:[#allocation5 + $0xf0] sm:$0xff] }
  0x3e   : > { %592 = vmatprep.subr.mxu1 %v851_v0  ;;  %624 = vmatprep.mubr.msk.f32.mxu1 %vm852_vm0, %v851_v0  ;;  %v238_v2 = vld [vmem:[#allocation5 + $0x78] sm:$0xff]  ;;  %v237_v4 = vld [vmem:[#allocation5 + $0x70] sm:$0xff]  ;;  %v252_v5 = vld [vmem:[#allocation5 + $0xe8] sm:$0xff]  ;;  %s534_s20 = sshll.u32 %s983_s10, 3  ;;  %s537_s26 = sshll.u32 %s837_s15, 7 }
  0x3f   : > { %540 = vmatprep.subr.mxu0 %v254_v1  ;;  %v270_v6 = vld [vmem:[#allocation5 + $0x178] sm:$0xff]  ;;  %v236_v7 = vld [vmem:[#allocation5 + $0x68] sm:$0xff]  ;;  %v269_v8 = vld [vmem:[#allocation5 + $0x170] sm:$0xff]  ;;  %s219_s27 = scalar_lea.vmem [#allocation7], %s534_s20  ;;  %s432_s4 = scalar_lea.hbm %s1064_s3, %s537_s26 }
  0x40   : > { %541 = vmatpush3.msra.mxu0 %v238_v2  ;;  %593 = vmatpush3.msra.mxu1 %v270_v6  ;;  %v251_v9 = vld [vmem:[#allocation5 + $0xe0] sm:$0xff]  ;;  %v268_v10 = vld [vmem:[#allocation5 + $0x168] sm:$0xff]  ;;  %v250_v12 = vld [vmem:[#allocation5 + $0xd8] sm:$0xff]  ;;  %s434_s29 = sshll.u32 %s219_s27, 4  ;;  %s420_s5 = scalar_lea.sflag [#allocation4], %s983_s10  ;;  %s435_s29 = int_to_ptr.vmem [resolvable:$true] %s434_s29 }
  0x41   : > { %542 = vmatprep.subr.mxu0 %v253_v3  ;;  %594 = vmatprep.subr.mxu1 %v851_v0  ;;  %v235_v11 = vld [vmem:[#allocation5 + $0x60] sm:$0xff]  ;;  %v234_v14 = vld [vmem:[#allocation5 + $0x58] sm:$0xff]  ;;  %v249_v15 = vld [vmem:[#allocation5 + $0xd0] sm:$0xff]  ;;  %s761_s6 = scalar_lea.vmem %s435_s29, 128  ;;  %s853_s7 = smov [#allocation7]  }
  0x42   : > { %543 = vmatpush3.msra.mxu0 %v237_v4  ;;  %595 = vmatpush3.msra.mxu1 %v269_v8  ;;  %v267_v13 = vld [vmem:[#allocation5 + $0x160] sm:$0xff]  ;;  %v266_v16 = vld [vmem:[#allocation5 + $0x158] sm:$0xff]  ;;  %v233_v17 = vld [vmem:[#allocation5 + $0x50] sm:$0xff]  ;;  %p762_p1 = scmp.ne.s32.totalorder %s435_s29, %s761_s6  ;;  %s765_s9 = sshll.u32 %s853_s7, 4  ;;  %s766_s9 = int_to_ptr.vmem [resolvable:$false] %s765_s9 }
  0x43   : > { %544 = vmatprep.subr.mxu0 %v252_v5  ;;  %596 = vmatprep.subr.mxu1 %v851_v0  ;;  %v248_v18 = vld [vmem:[#allocation5 + $0xc8] sm:$0xff]  ;;  %v265_v19 = vld [vmem:[#allocation5 + $0x150] sm:$0xff]  ;;  %v247_v21 = vld [vmem:[#allocation5 + $0xc0] sm:$0xff]  ;;  %s767_s15 = scalar_lea.vmem %s766_s9, 256  ;;  %p768_p2 = scmp.lt.s32.totalorder %s435_s29, %s766_s9 }
  0x44   : > { %545 = vmatpush3.msra.mxu0 %v236_v7  ;;  %597 = vmatpush3.msra.mxu1 %v268_v10  ;;  %v232_v20 = vld [vmem:[#allocation5 + $0x48] sm:$0xff]  ;;  %v231_v23 = vld [vmem:[#allocation5 + $0x40] sm:$0xff]  ;;  %v246_v24 = vld [vmem:[#allocation5 + $0xb8] sm:$0xff]  ;;  %p763_p8 = pnand %p762_p1, %p957_p13  ;;  %p769_p5 = scmp.lt.s32.totalorder %s767_s15, %s761_s6 }
  0x45   : > { %546 = vmatprep.subr.mxu0 %v251_v9  ;;  %598 = vmatprep.subr.mxu1 %v851_v0  ;;  %v264_v22 = vld [vmem:[#allocation5 + $0x148] sm:$0xff]  ;;  %v263_v25 = vld [vmem:[#allocation5 + $0x140] sm:$0xff]  ;;  %v230_v26 = vld [vmem:[#allocation5 + $0x38] sm:$0xff] }
  0x46   : > { %547 = vmatpush3.msra.mxu0 %v235_v11  ;;  %599 = vmatpush3.msra.mxu1 %v267_v13  ;;  %v245_v27 = vld [vmem:[#allocation5 + $0xb0] sm:$0xff]  ;;  %v262_v28 = vld [vmem:[#allocation5 + $0x138] sm:$0xff]  ;;  %v244_v30 = vld [vmem:[#allocation5 + $0xa8] sm:$0xff]  ;;  %p764_p11 = pneg %p763_p8  ;;  %p770_p7 = por %p769_p5, %p768_p2 }
  0x47   : > { %548 = vmatprep.subr.mxu0 %v250_v12  ;;  %600 = vmatprep.subr.mxu1 %v851_v0  ;;  %v229_v29 = vld [vmem:[#allocation5 + $0x30] sm:$0xff]  ;;  %v228_v32 = vld [vmem:[#allocation5 + $0x28] sm:$0xff]  ;;  %v243_v33 = vld [vmem:[#allocation5 + $0xa0] sm:$0xff] }
  0x48   : > { %549 = vmatpush3.msra.mxu0 %v234_v14  ;;  %601 = vmatpush3.msra.mxu1 %v266_v16  ;;  %v261_v31 = vld [vmem:[#allocation5 + $0x130] sm:$0xff]  ;;  %v260_v34 = vld [vmem:[#allocation5 + $0x128] sm:$0xff]  ;;  %v227_v35 = vld [vmem:[#allocation5 + $0x20] sm:$0xff]  ;;  %p771_p6 = pnand %p770_p7, %p764_p11 }
  0x49   : > { %550 = vmatprep.subr.mxu0 %v249_v15  ;;  %602 = vmatprep.subr.mxu1 %v851_v0  ;;  %v242_v36 = vld [vmem:[#allocation5 + $0x98] sm:$0xff]  ;;  %v259_v37 = vld [vmem:[#allocation5 + $0x120] sm:$0xff]  ;;  %v241_v39 = vld [vmem:[#allocation5 + $0x90] sm:$0xff] }
  0x4a   : > { %551 = vmatpush3.msra.mxu0 %v233_v17  ;;  %603 = vmatpush3.msra.mxu1 %v265_v19  ;;  %v226_v38 = vld [vmem:[#allocation5 + $0x18] sm:$0xff]  ;;  %v225_v41 = vld [vmem:[#allocation5 + $0x10] sm:$0xff]  ;;  %v240_v42 = vld [vmem:[#allocation5 + $0x88] sm:$0xff] }
  0x4b   : > { %552 = vmatprep.subr.mxu0 %v248_v18  ;;  %604 = vmatprep.subr.mxu1 %v851_v0  ;;  %v258_v40 = vld [vmem:[#allocation5 + $0x118] sm:$0xff]  ;;  %v224_v44 = vld [vmem:[#allocation5 + $0x8] sm:$0xff]  ;;  %v257_v45 = vld [vmem:[#allocation5 + $0x110] sm:$0xff] }
  0x4c   : > { %553 = vmatpush3.msra.mxu0 %v232_v20  ;;  %605 = vmatpush3.msra.mxu1 %v264_v22  ;;  %v221_v43 = vld [vmem:[%s987_s25 + $0x8] sm:$0xff]  ;;  %v239_v46 = vld [vmem:[#allocation5 + $0x80] sm:$0xff]  ;;  %v256_v48 = vld [vmem:[#allocation5 + $0x108] sm:$0xff] }
  0x4d   : > { %554 = vmatprep.subr.mxu0 %v247_v21  ;;  %606 = vmatprep.subr.mxu1 %v851_v0  ;;  %v223_v47 = vld [vmem:[#allocation5] sm:$0xff]  ;;  %v220_v49 = vld [vmem:[%s987_s25] sm:$0xff] }
  0x4e   : > { %555 = vmatpush3.msra.mxu0 %v231_v23  ;;  %607 = vmatpush3.msra.mxu1 %v263_v25  ;;  %v255_v50 = vld [vmem:[#allocation5 + $0x100] sm:$0xff]  ;;  %v535_v54 = vld [vmem:[%s1063_s2] ss:$0 sm:$0xff] }
  0x4f   : > { %556 = vmatprep.subr.mxu0 %v246_v24  ;;  %608 = vmatprep.subr.mxu1 %v851_v0  ;;  %v222_v51 = vld [vmem:[%s987_s25 + $0x10] sm:$0xff] }
  0x50   : > { %557 = vmatpush3.msra.mxu0 %v230_v26  ;;  %609 = vmatpush3.msra.mxu1 %v262_v28 }
  0x51   : > { %558 = vmatprep.subr.mxu0 %v245_v27  ;;  %610 = vmatprep.subr.mxu1 %v851_v0 }
  0x52   : > { %559 = vmatpush3.msra.mxu0 %v229_v29  ;;  %611 = vmatpush3.msra.mxu1 %v261_v31 }
  0x53   : > { %560 = vmatprep.subr.mxu0 %v244_v30  ;;  %612 = vmatprep.subr.mxu1 %v851_v0 }
  0x54   : > { %561 = vmatpush3.msra.mxu0 %v228_v32  ;;  %613 = vmatpush3.msra.mxu1 %v260_v34 }
  0x55   : > { %562 = vmatprep.subr.mxu0 %v243_v33  ;;  %614 = vmatprep.subr.mxu1 %v851_v0 }
  0x56   : > { %563 = vmatpush3.msra.mxu0 %v227_v35  ;;  %615 = vmatpush3.msra.mxu1 %v259_v37 }
  0x57   : > { %564 = vmatprep.subr.mxu0 %v242_v36  ;;  %616 = vmatprep.subr.mxu1 %v851_v0 }
  0x58   : > { %565 = vmatpush3.msra.mxu0 %v226_v38  ;;  %617 = vmatpush3.msra.mxu1 %v258_v40 }
  0x59   : > { %566 = vmatprep.subr.mxu0 %v241_v39  ;;  %618 = vmatprep.subr.mxu1 %v851_v0 }
  0x5a   : > { %567 = vmatpush3.msra.mxu0 %v225_v41  ;;  %342 = vmatprep.mubr.f32.mxu0 %v221_v43 }
  0x5b   : > { %568 = vmatprep.subr.mxu0 %v240_v42  ;;  %619 = vmatpush3.msra.mxu1 %v257_v45 }
  0x5c   : > { %569 = vmatpush3.msra.mxu0 %v224_v44  ;;  %620 = vmatprep.subr.mxu1 %v851_v0 }
  0x5d   : > { %570 = vmatprep.subr.mxu0 %v239_v46  ;;  %621 = vmatpush3.msra.mxu1 %v256_v48 }
  0x5e   : > { %571 = vmatpush3.msra.mxu0 %v223_v47  ;;  %622 = vmatprep.subr.mxu1 %v851_v0 }
  0x5f   : > { %343 = vmatmul.mubr.f32.vlgmr.msra.gmra.mxu0 %v220_v49  ;;  %623 = vmatpush3.msra.mxu1 %v255_v50 }
  0x60   : > { %625 = vmatmul.mubr.f32.vlgmr.msra.gmra.mxu1 %v222_v51 }
 0x11f   : > { %v572_v52 = vpop.f32.mrf.mxu0 }
 0x120   : > { %v414_v55 = vpop.f32.mrf.mxu1 }
 0x121   : > { %v573_v53 = vpop.f32.mrf.mxu0 }
 0x122   : > { %v574_v56 = vadd.f32 %v573_v53, %v572_v52  ;;  %v626_v57 = vpop.f32.mrf.mxu1 }
 0x124   : > { %v345_v58 = vadd.f32 %v574_v56, %v535_v54 }
 0x126   : > { %v415_v59 = vadd.f32 %v414_v55, %v345_v58 }
 0x128   : > { %418 = vst [vmem:[%s219_s27] sm:$0xff] %v415_v59 }
 0x129   : > { %774 = shalt.err (!%p771_p6)
}
 0x12a   : > { %s775_s11 = scalar_lea.hbm %s432_s4, 128  ;;  %s779_s25 = scalar_lea.hbm %s1064_s3, 256 }
 0x12b   : > { %p776_p4 = scmp.ne.s32.totalorder %s432_s4, %s775_s11  ;;  %p780_p0 = scmp.lt.s32.totalorder %s432_s4, %s1064_s3 }
 0x12c   : > { %p781_p3 = scmp.lt.s32.totalorder %s779_s25, %s775_s11 }
 0x12d   : > { %p777_p9 = pnand %p776_p4, %p957_p13 }
 0x12e   : > { %p782_p1 = por %p781_p3, %p780_p0 }
 0x12f   : > { %p778_p12 = pneg %p777_p9 }
 0x131   : > { %p783_p8 = pnand %p782_p1, %p778_p12 }
 0x133   : > { %786 = shalt.err (!%p783_p8)
}
 0x134   : > { %636 = dma.vmem_to_hbm [thread:$0]  (%p957_p13), %s435_s29, 128, %s432_s4, %s420_s5  }
 0x135 PF: > { %s446_s24 = sand.u32 1, %s825_s12   ;;  %p1075_p11 = scmp.ne.s32.totalorder %s1069_s23, 0 }
 0x136   : > { %s447_s26 = scalar_lea.sflag [#allocation4], %s446_s24 }
 0x137   : > { %p647_p2 = pnand %p530_p10, %p1075_p11 }
 0x139   : > { %p648_p5 = pneg %p647_p2 }
 0x13b   : > { %820 = dma.done.wait (%p648_p5), %s447_s26, 128  }
 0x13c   : > { %822 = vsyncadd (%p648_p5), %s447_s26, 4294967168  ;;  %s20_s17 = sadd.s32 1, %s845_s17   ;;  %s1076_s12 = smov %s829_s13 }
 0x13d   : > { %p17_p7 = scmp.ge.s32.totalorder %s20_s17, 4   ;;  %s1077_s13 = smov %s833_s14 }
 0x13e   : > { %s1078_s14 = smov %s966_s18  ;;  %s1079_s15 = smov %s841_s16 }
 0x13f   : > { %s1080_s16 = smov %s1082_s28  ;;  %19 = sbr.rel (!%p17_p7) target bundleno = 7 (0x7), region = 81 }
 0x144   :  { %452 = vsyncpa [#allocation3], 1 }
 0x145   :  { %454 = vsyncpa [#allocation3 + $0x1], 1 }
 0x146   :  { %455 = vsyncpa [#allocation6], 1 }
 0x147   :  { %456 = vsyncpa [#allocation4], 1 }
 0x148   :  { %458 = vsyncpa [#allocation4 + $0x1], 1 }

</bundles_post_ra>
